<compile_context>
chip_gen: v7x
topology: tpu7x:2x2x1
jax: 0.10.0
libtpu: 0.0.40
codegen_flags: <defaults>
</compile_context>

<pallas_src>
import functools
import math

import numpy as np

import jax
import jax.numpy as jnp
from jax.experimental import pallas as pl
from jax.experimental.pallas import tpu as pltpu


def _round_up(x: int, m: int) -> int:
    return (x + m - 1) // m * m


def _tpu_vmem_bytes(default: int = 64 * 1024 * 1024) -> int:
    """Best-effort VMEM capacity query; conservative (small) fallback."""
    try:
        info = pltpu.get_tpu_info()
        v = getattr(info, "vmem_capacity_bytes", None)
        if v:
            return int(v)
    except Exception:
        pass
    return default


def _num_tensorcores(default: int = 1) -> int:
    """Best-effort TensorCore count; single-core fallback (safe everywhere)."""
    try:
        info = pltpu.get_tpu_info()
        for attr in ("num_tensorcores", "num_cores", "tensorcore_count",
                     "cores_per_chip", "num_cores_per_chip"):
            v = getattr(info, attr, None)
            if v:
                return int(v)
    except Exception:
        pass
    return default


def _smooth_kernel(mask_ref, x_ref, out_ref, acc_ref, *, spatial, strides):
    """Accumulate the sum of squared, masked forward differences for one block.

    mask_ref : (8, Lp) f32, row i is the keep-mask for spatial axis i (also
               zeroing lane padding).  Constant index_map -> VMEM-resident.
    x_ref    : (T, Lp) block -- T flattened slabs, Lp = padded prod(spatial).
    out_ref  : (1, 8, 128) partial-sum block for this parallel partition.
    acc_ref  : (8, Lp) f32 scratch accumulator (persists across the inner axis).
    """
    # Reset the accumulator at the start of each partition's inner loop.
    @pl.when(pl.program_id(1) == 0)
    def _():
        acc_ref[...] = jnp.zeros_like(acc_ref)

    x = x_ref[...].astype(jnp.float32)          # (T, Lp); f32 math for accuracy
    t, l = x.shape

    for i, (n_i, s_i) in enumerate(zip(spatial, strides)):
        if n_i == 1:
            continue  # forward difference along a size-1 axis is identically 0
        # Neighbour one step ahead along spatial axis i sits s_i lanes to the
        # right; pltpu.roll needs a non-negative shift, so roll by l - s_i
        # (== jnp.roll(x, -s_i, axis=1)).  Wrap / lane-padding positions read
        # garbage but are zeroed by the mask below.
        nbr = pltpu.roll(x, shift=l - s_i, axis=1)
        d = nbr - x
        # Fold the T slab rows onto 8 sublanes with pure vreg adds, then apply
        # the per-lane mask once at (8, Lp) (mask is row-independent and 0/1,
        # so masking after the square+fold is exact).
        folded = (d * d).reshape(t // 8, 8, l).sum(axis=0)      # (8, Lp)
        acc_ref[...] += folded * mask_ref[i:i + 1, :]

    # Single cross-lane reduction + (narrow) output store, once per partition.
    @pl.when(pl.program_id(1) == pl.num_programs(1) - 1)
    def _():
        out_ref[...] = jnp.full(out_ref.shape, jnp.sum(acc_ref[...]),
                                dtype=jnp.float32)


def spatial_smoothing_loss(pred: jax.Array, *,
                           block_bytes: int | None = None,
                           max_partitions: int | None = None) -> jax.Array:
    """Pallas implementation of SpatialSmoothingLoss.forward (any ndims)."""
    shape = pred.shape
    ndims = shape[1]
    assert len(shape) == ndims + 2, "channel count must equal spatial ndims"
    batch = shape[0]
    spatial = tuple(int(d) for d in shape[2:])
    L = math.prod(spatial)
    strides = tuple(math.prod(spatial[i + 1:]) for i in range(ndims))
    Lp = _round_up(L, 128)                      # lane-pad each slab row

    n_slabs = batch * ndims                     # C == ndims channels per item
    x = pred.reshape(n_slabs, L)                # keep caller dtype (bf16 ok)
    elem = x.dtype.itemsize
    pack = max(8, 32 // elem)                   # sublane pack: 8 f32 / 16 bf16 / 32 i8

    # Host-side precomputed wrap + lane-padding mask: row i keeps positions
    # whose coordinate along spatial axis i is not the last one.
    flat = np.arange(Lp)
    mask_np = np.zeros((8, Lp), np.float32)
    for i, (n_i, s_i) in enumerate(zip(spatial, strides)):
        keep = (flat < L) & (((flat // s_i) % n_i) != (n_i - 1))
        mask_np[i] = keep.astype(np.float32)
    mask = jnp.asarray(mask_np)

    vmem_cap = _tpu_vmem_bytes()
    if max_partitions is None:
        max_partitions = _num_tensorcores()
    n_parts = (max_partitions
               if (max_partitions > 1 and n_slabs >= pack * max_partitions)
               else 1)

    # Target per-block f32-intermediate footprint: ~4 MiB on 128-MiB-VMEM chips
    # (v5e/v6e), ~2 MiB otherwise (v7x / unknown).
    if block_bytes is None:
        block_bytes = (4 << 20) if vmem_cap >= (100 << 20) else (2 << 20)

    row_f32 = Lp * 4
    tile = max(pack, (block_bytes // row_f32) // pack * pack)

    # Corrected VMEM accounting (review): double-buffered input at its own
    # dtype + ~4 live (tile, Lp) f32 temps + acc scratch + resident mask.
    per_row_bytes = Lp * (2 * elem + 4 * 4)
    fixed_bytes = 8 * Lp * 4 + 2 * 8 * Lp * 4
    slack = 1 << 20
    budget = min(vmem_cap * 3 // 4, 96 << 20)   # <=48 MiB on v7x, <=96 MiB else
    max_tile = ((budget - fixed_bytes - slack) // per_row_bytes) // pack * pack
    if max_tile < pack:
        # TODO(synk): spatially tiled (halo) variant for huge 3-D fields.
        raise ValueError(
            f"spatial field too large for flat-slab kernel (L={L}, VMEM budget "
            f"{budget} B); needs the spatially tiled variant")
    tile = min(tile, max_tile, _round_up(pl.cdiv(n_slabs, n_parts), pack))

    n_pad = _round_up(n_slabs, tile * n_parts)
    if n_pad != n_slabs or Lp != L:
        # zero rows / zero lanes contribute exactly 0 to the masked sum
        x = jnp.pad(x, ((0, n_pad - n_slabs), (0, Lp - L)))
    n_blocks = n_pad // (tile * n_parts)

    est_vmem = tile * per_row_bytes + fixed_bytes + slack
    vmem_limit = est_vmem if est_vmem > (16 << 20) else None  # raise only if needed

    kernel = functools.partial(_smooth_kernel, spatial=spatial, strides=strides)
    partials = pl.pallas_call(
        kernel,
        out_shape=jax.ShapeDtypeStruct((n_parts, 8, 128), jnp.float32),
        grid_spec=pltpu.PrefetchScalarGridSpec(
            num_scalar_prefetch=0,
            grid=(n_parts, n_blocks),
            in_specs=[
                # constant index_map -> DMA'd once, stays VMEM-resident
                pl.BlockSpec((8, Lp), lambda p, i: (0, 0)),
                pl.BlockSpec((tile, Lp), lambda p, i: (p * n_blocks + i, 0)),
            ],
            out_specs=pl.BlockSpec((1, 8, 128), lambda p, i: (p, 0, 0)),
            scratch_shapes=[pltpu.VMEM((8, Lp), jnp.float32)],
        ),
        compiler_params=pltpu.CompilerParams(
            dimension_semantics=("parallel", "arbitrary"),
            vmem_limit_bytes=vmem_limit),
    )(mask, x)

    # mean over d_pred of shape (B, ndims*ndims, *spatial)
    denom = batch * ndims * ndims * L
    total = jnp.sum(partials[:, 0, 0])
    return (total / denom).astype(pred.dtype)


def _reference_loss(pred: jax.Array) -> jax.Array:
    """Pure-JAX port of the PyTorch forward, for verification (f32 math)."""
    shape = pred.shape
    ndims = shape[1]
    x = pred.astype(jnp.float32)
    d_preds = []
    for i in range(ndims):
        ax = i + 2
        d = jnp.roll(x, -1, axis=ax) - x
        idx = [slice(None)] * len(shape)
        idx[ax] = slice(-1, None)
        d = d.at[tuple(idx)].set(0.0)
        d_preds.append(d)
    d = jnp.stack(d_preds, axis=1).reshape(shape[0], ndims * ndims, *shape[2:])
    return jnp.mean(d ** 2)


if __name__ == "__main__":
    key = jax.random.PRNGKey(0)
    cases = [
        ("2d", (2, 2, 16, 16), jnp.float32, {}),
        ("3d", (1, 3, 8, 8, 8), jnp.float32, {}),
        # small block_bytes + forced 2 partitions exercise the multi-step
        # accumulation and the partitioned-output paths
        ("2d multi-block / 2-partition", (16, 2, 16, 16), jnp.float32,
         {"block_bytes": 8 * 1024, "max_partitions": 2}),
        # odd prod(spatial) -> lane-padded rows + mask-zeroed padding
        ("2d odd-L (12x12)", (2, 2, 12, 12), jnp.float32, {}),
        ("2d bf16 input", (2, 2, 16, 16), jnp.bfloat16, {}),
    ]
    for name, shp, dtype, kwargs in cases:
        key, sub = jax.random.split(key)
        pred = jax.random.normal(sub, shp, dtype=jnp.float32).astype(dtype)
        loss = spatial_smoothing_loss(pred, **kwargs)
        jax.block_until_ready(loss)
        ref = _reference_loss(pred)
        rtol = 1e-2 if dtype == jnp.bfloat16 else 1e-5
        atol = 1e-3 if dtype == jnp.bfloat16 else 1e-6
        assert jnp.allclose(jnp.asarray(loss, jnp.float32), ref,
                            rtol=rtol, atol=atol), (name, loss, ref)
    print("KERNEL_OK")
</pallas_src>

<mosaic_0001>
module attributes {stable_mosaic.version = 11 : i64} {
  func.func @_smooth_kernel(%arg0: i32, %arg1: i32, %arg2: memref<8x256xf32, #tpu.memory_space<vmem>>, %arg3: memref<8x256xf32, #tpu.memory_space<vmem>>, %arg4: memref<1x8x128xf32, #tpu.memory_space<vmem>>, %arg5: memref<8x256xf32, #tpu.memory_space<vmem>>) attributes {dimension_semantics = [#tpu.dimension_semantics<parallel>, #tpu.dimension_semantics<arbitrary>], iteration_bounds = array<i64: 1, 1>, scalar_prefetch = 0 : i64, scratch_operands = 1 : i64, tpu.core_type = #tpu.core_type<tc>, window_params = [{pipeline_mode = #tpu.pipeline_mode<synchronous>, transform_indices = @transform_0, window_bounds = array<i64: 8, 256>}, {transform_indices = @transform_1, window_bounds = array<i64: 8, 256>}, {transform_indices = @transform_2, window_bounds = array<i64: 1, 8, 128>}]} {
    %c0_i32 = arith.constant 0 : i32
    %0 = arith.cmpi eq, %arg1, %c0_i32 : i32
    %1 = arith.extui %0 : i1 to i32
    %c0_i32_0 = arith.constant 0 : i32
    %2 = arith.cmpi ne, %1, %c0_i32_0 : i32
    scf.if %2 {
      %cst_16 = arith.constant 0.000000e+00 : f32
      %29 = vector.broadcast %cst_16 : f32 to vector<8x256xf32>
      %c0_17 = arith.constant 0 : index
      %c0_18 = arith.constant 0 : index
      %30 = vector.load %arg5[%c0_17, %c0_18] : memref<8x256xf32, #tpu.memory_space<vmem>>, vector<8x256xf32>
      tpu.vector_store %arg5[%c0_17, %c0_18], %29 {strides = array<i32>} : memref<8x256xf32, #tpu.memory_space<vmem>>, vector<8x256xf32>,
    } else {
    }
    %c0 = arith.constant 0 : index
    %c0_1 = arith.constant 0 : index
    %3 = vector.load %arg3[%c0, %c0_1] : memref<8x256xf32, #tpu.memory_space<vmem>>, vector<8x256xf32>
    %c240_i32 = arith.constant 240 : i32
    %4 = tpu.dynamic_rotate %3 by %c240_i32 dim 1 : vector<8x256xf32>, i32 -> vector<8x256xf32>
    %5 = arith.subf %4, %3 : vector<8x256xf32>
    %6 = arith.mulf %5, %5 : vector<8x256xf32>
    %7 = vector.shape_cast %6 : vector<8x256xf32> to vector<1x8x256xf32>
    %cst = arith.constant dense<0.000000e+00> : vector<8x256xf32>
    %8 = vector.multi_reduction <add>, %7, %cst [0] : vector<1x8x256xf32> to vector<8x256xf32>
    %c0_2 = arith.constant 0 : index
    %c0_3 = arith.constant 0 : index
    %9 = vector.load %arg5[%c0_2, %c0_3] : memref<8x256xf32, #tpu.memory_space<vmem>>, vector<8x256xf32>
    %c0_4 = arith.constant 0 : index
    %c0_5 = arith.constant 0 : index
    %10 = vector.load %arg2[%c0_4, %c0_5] : memref<8x256xf32, #tpu.memory_space<vmem>>, vector<1x256xf32>
    %11 = vector.broadcast %10 : vector<1x256xf32> to vector<8x256xf32>
    %12 = arith.mulf %8, %11 : vector<8x256xf32>
    %13 = arith.addf %9, %12 : vector<8x256xf32>
    %c0_6 = arith.constant 0 : index
    %c0_7 = arith.constant 0 : index
    %14 = vector.load %arg5[%c0_6, %c0_7] : memref<8x256xf32, #tpu.memory_space<vmem>>, vector<8x256xf32>
    tpu.vector_store %arg5[%c0_6, %c0_7], %13 {strides = array<i32>} : memref<8x256xf32, #tpu.memory_space<vmem>>, vector<8x256xf32>,
    %c255_i32 = arith.constant 255 : i32
    %15 = tpu.dynamic_rotate %3 by %c255_i32 dim 1 : vector<8x256xf32>, i32 -> vector<8x256xf32>
    %16 = arith.subf %15, %3 : vector<8x256xf32>
    %17 = arith.mulf %16, %16 : vector<8x256xf32>
    %18 = vector.shape_cast %17 : vector<8x256xf32> to vector<1x8x256xf32>
    %cst_8 = arith.constant dense<0.000000e+00> : vector<8x256xf32>
    %19 = vector.multi_reduction <add>, %18, %cst_8 [0] : vector<1x8x256xf32> to vector<8x256xf32>
    %c0_9 = arith.constant 0 : index
    %c0_10 = arith.constant 0 : index
    %20 = vector.load %arg5[%c0_9, %c0_10] : memref<8x256xf32, #tpu.memory_space<vmem>>, vector<8x256xf32>
    %c1 = arith.constant 1 : index
    %c0_11 = arith.constant 0 : index
    %21 = vector.load %arg2[%c1, %c0_11] : memref<8x256xf32, #tpu.memory_space<vmem>>, vector<1x256xf32>
    %22 = vector.broadcast %21 : vector<1x256xf32> to vector<8x256xf32>
    %23 = arith.mulf %19, %22 : vector<8x256xf32>
    %24 = arith.addf %20, %23 : vector<8x256xf32>
    %c0_12 = arith.constant 0 : index
    %c0_13 = arith.constant 0 : index
    %25 = vector.load %arg5[%c0_12, %c0_13] : memref<8x256xf32, #tpu.memory_space<vmem>>, vector<8x256xf32>
    tpu.vector_store %arg5[%c0_12, %c0_13], %24 {strides = array<i32>} : memref<8x256xf32, #tpu.memory_space<vmem>>, vector<8x256xf32>,
    %c0_i32_14 = arith.constant 0 : i32
    %26 = arith.cmpi eq, %arg1, %c0_i32_14 : i32
    %27 = arith.extui %26 : i1 to i32
    %c0_i32_15 = arith.constant 0 : i32
    %28 = arith.cmpi ne, %27, %c0_i32_15 : i32
    scf.if %28 {
      %c0_16 = arith.constant 0 : index
      %c0_17 = arith.constant 0 : index
      %29 = vector.load %arg5[%c0_16, %c0_17] : memref<8x256xf32, #tpu.memory_space<vmem>>, vector<8x256xf32>
      %30 = vector.shape_cast %29 : vector<8x256xf32> to vector<1x8x256xf32>
      %cst_18 = arith.constant dense<0.000000e+00> : vector<1xf32>
      %31 = vector.multi_reduction <add>, %30, %cst_18 [1, 2] : vector<1x8x256xf32> to vector<1xf32>
      %32 = vector.shape_cast %31 : vector<1xf32> to vector<1x1x1xf32>
      %33 = vector.extract %32[0, 0, 0] : f32 from vector<1x1x1xf32>
      %34 = vector.broadcast %33 : f32 to vector<1x8x128xf32>
      %c0_19 = arith.constant 0 : index
      %c0_20 = arith.constant 0 : index
      %c0_21 = arith.constant 0 : index
      %35 = vector.load %arg4[%c0_19, %c0_20, %c0_21] : memref<1x8x128xf32, #tpu.memory_space<vmem>>, vector<1x8x128xf32>
      tpu.vector_store %arg4[%c0_19, %c0_20, %c0_21], %34 {strides = array<i32>} : memref<1x8x128xf32, #tpu.memory_space<vmem>>, vector<1x8x128xf32>,
    } else {
    }
    return
  }
  func.func @transform_0(%arg0: i32, %arg1: i32) -> (i32, i32) {
    %c0_i32 = arith.constant 0 : i32
    %c0_i32_0 = arith.constant 0 : i32
    %c0_i32_1 = arith.constant 0 : i32
    return %c0_i32, %c0_i32_0 : i32, i32
  }
  func.func @transform_1(%arg0: i32, %arg1: i32) -> (i32, i32) {
    %c1_i32 = arith.constant 1 : i32
    %0 = arith.muli %arg0, %c1_i32 : i32
    %1 = arith.addi %0, %arg1 : i32
    %c0_i32 = arith.constant 0 : i32
    %c0_i32_0 = arith.constant 0 : i32
    return %1, %c0_i32 : i32, i32
  }
  func.func @transform_2(%arg0: i32, %arg1: i32) -> (i32, i32, i32) {
    %c0_i32 = arith.constant 0 : i32
    %c0_i32_0 = arith.constant 0 : i32
    %c0_i32_1 = arith.constant 0 : i32
    return %arg0, %c0_i32, %c0_i32_0 : i32, i32, i32
  }
}

</mosaic_0001>

<bundles_post_ra>
// kernel: tpu_custom_call.1
= control target key start
LH: loop header
LB: loop body
LE: loop exit
PB: predicated region body
PF: predicated region fallthrough
CT: control target
= control target key end

     0   :  { %7 = vsyncpa [#allocation4], 0  ;;  %s286_s0 = inlined_call_operand.hbm [shape: f32[8,256], index: 0, kind: input, shape index: {}]   ;;  %s287_s1 = inlined_call_operand.hbm [shape: f32[8,256], index: 1, kind: input, shape index: {}]   ;;  %s288_s2 = inlined_call_operand.hbm [shape: f32[1,8,128], index: 2, kind: output, shape index: {}]  }
   0x1   :  { %8 = vsyncpa [#allocation7], 0 }
   0x2   :  { %9 = vsyncpa [#allocation5], 0  ;;  %s230_s9 = smov [#allocation3]   ;;  %s231_s11 = smov [#allocation6]  }
   0x3   :  { %s16_s10 = sshll.u32 %s230_s9, 4  ;;  %s30_s12 = sshll.u32 %s231_s11, 4  ;;  %s17_s10 = int_to_ptr.vmem [resolvable:$true] %s16_s10  ;;  %s31_s12 = int_to_ptr.vmem [resolvable:$true] %s30_s12 }
   0x4   :  { %s158_s15 = scalar_lea.hbm %s286_s0, 256 }
   0x5   :  { %p159_p0 = scmp.ne.s32.totalorder %s286_s0, %s158_s15  ;;  %p162_p1 = scmp.lt.u32.totalorder %s158_s15, %s286_s0 }
   0x7   :  { %p164_p2 = pnand %p162_p1, %p159_p0 }
   0x9   :  { %167 = shalt.err (!%p164_p2)
}
   0xa   :  { %s168_s20 = scalar_lea.vmem %s17_s10, 256  ;;  %p173_p4 = scmp.lt.s32.totalorder %s17_s10, %s17_s10 }
   0xb   :  { %p169_p3 = scmp.ne.s32.totalorder %s17_s10, %s168_s20  ;;  %p174_p5 = scmp.lt.s32.totalorder %s168_s20, %s168_s20 }
   0xd   :  { %p175_p6 = por %p174_p5, %p173_p4 }
   0xf   :  { %p176_p7 = pnand %p175_p6, %p169_p3 }
  0x11   :  { %179 = shalt.err (!%p176_p7)
}
  0x12   :  { %19 = dma.hbm_to_vmem [thread:$0]  %s286_s0, 256, %s17_s10, [#allocation4]  }
  0x13   :  { %s180_s25 = scalar_lea.hbm %s287_s1, 256 }
  0x14   :  { %p181_p8 = scmp.ne.s32.totalorder %s287_s1, %s180_s25  ;;  %p184_p9 = scmp.lt.u32.totalorder %s180_s25, %s287_s1 }
  0x16   :  { %p186_p10 = pnand %p184_p9, %p181_p8 }
  0x18   :  { %189 = shalt.err (!%p186_p10)
}
  0x19   :  { %s190_s30 = scalar_lea.vmem %s31_s12, 256  ;;  %p195_p12 = scmp.lt.s32.totalorder %s31_s12, %s31_s12 }
  0x1a   :  { %p191_p11 = scmp.ne.s32.totalorder %s31_s12, %s190_s30  ;;  %p196_p13 = scmp.lt.s32.totalorder %s190_s30, %s190_s30 }
  0x1c   :  { %p197_p0 = por %p196_p13, %p195_p12 }
  0x1e   :  { %p198_p1 = pnand %p197_p0, %p191_p11 }
  0x20   :  { %201 = shalt.err (!%p198_p1)
}
  0x21   :  { %33 = dma.hbm_to_vmem [thread:$0]  %s287_s1, 256, %s31_s12, [#allocation7]  }
  0x22   :  { %224 = dma.done.wait [#allocation4], 256  }
  0x23   :  { %225 = vsyncadd [#allocation4], 4294967040 }
  0x24   :  { %226 = dma.done.wait [#allocation7], 256  }
  0x25   :  { %227 = vsyncadd [#allocation7], 4294967040  ;;  %v47_v0 = vld [vmem:[#allocation6] sm:$0xff]  ;;  %s232_s4 = smov 127   ;;  %s233_s5 = smov 112   ;;  %v48_v1 = vld [vmem:[#allocation6 + $0x8] sm:$0xff]  ;;  %v53_v2 = vlaneseq }
  0x26   :  { %84 = vrot.lane.b32.xlu1 %v47_v0, %s232_s4  ;;  %49 = vrot.lane.b32.xlu0 %v47_v0, %s233_s5  ;;  %v100_v9 = vld [vmem:[#allocation3 + $0x1] ss:$8 sm:$0x3]  ;;  %v66_v10 = vld [vmem:[#allocation3] ss:$8 sm:$0x3] }
  0x27   :  { %v69_v3 = vshrl.u32 %v53_v2, 7  ;;  %v54_v4 = vand.u32 127, %v53_v2  ;;  %s234_s1 = smov [#allocation8]  }
  0x28   :  { %s141_s6 = sshll.u32 %s234_s1, 4  ;;  %s142_s6 = int_to_ptr.vmem [resolvable:$true] %s141_s6 }
  0x29   :  { %v70_v7 = vsub.s32 0, %v69_v3  ;;  %v74_v8 = vsub.s32 1, %v69_v3  ;;  %vm88_vm0 = vcmp.lt.s32.totalorder %v54_v4, 127  ;;  %vm55_vm1 = vcmp.lt.s32.totalorder %v54_v4, 112  ;;  %s202_s8 = scalar_lea.vmem %s142_s6, 128  ;;  %p207_p3 = scmp.lt.s32.totalorder %s142_s6, %s142_s6 }
  0x2a   :  { %86 = vrot.lane.b32.xlu1 %v48_v1, %s232_s4  ;;  %51 = vrot.lane.b32.xlu0 %v48_v1, %s233_s5  ;;  %p203_p2 = scmp.ne.s32.totalorder %s142_s6, %s202_s8  ;;  %p208_p4 = scmp.lt.s32.totalorder %s202_s8, %s202_s8 }
  0x2b   :  { %v105_v11 = vrot.slane %v100_v9, %v70_v7  ;;  %v109_v12 = vrot.slane %v100_v9, %v74_v8  ;;  %v71_v14 = vrot.slane %v66_v10, %v70_v7  ;;  %v75_v15 = vrot.slane %v66_v10, %v74_v8 }
  0x2c   :  { %p209_p5 = por %p208_p4, %p207_p3 }
  0x2e   :  { %p210_p6 = pnand %p209_p5, %p203_p2 }
  0x98   :  { %v85_v5 = vpop.permute.xlu1 %84  ;;  %v50_v6 = vpop.permute.xlu0 %49 }
  0x9c   :  { %v87_v13 = vpop.permute.xlu1 %86  ;;  %v52_v16 = vpop.permute.xlu0 %51 }
  0x9d   :  { %v89_v17 = vsel %vm88_vm0, %v85_v5, %v87_v13  ;;  %v90_v18 = vsel %vm88_vm0, %v87_v13, %v85_v5  ;;  %v56_v19 = vsel %vm55_vm1, %v50_v6, %v52_v16  ;;  %v57_v20 = vsel %vm55_vm1, %v52_v16, %v50_v6 }
  0x9e   :  { %v91_v21 = vsub.f32 %v89_v17, %v47_v0  ;;  %v92_v22 = vsub.f32 %v90_v18, %v48_v1  ;;  %v58_v23 = vsub.f32 %v56_v19, %v47_v0  ;;  %v59_v24 = vsub.f32 %v57_v20, %v48_v1 }
  0xa0   :  { %v93_v25 = vmul.f32 %v91_v21, %v91_v21  ;;  %v94_v26 = vmul.f32 %v92_v22, %v92_v22  ;;  %v60_v27 = vmul.f32 %v58_v23, %v58_v23  ;;  %v61_v28 = vmul.f32 %v59_v24, %v59_v24 }
  0xa2   :  { %v112_v29 = vmul.f32 %v105_v11, %v93_v25  ;;  %v113_v30 = vmul.f32 %v109_v12, %v94_v26  ;;  %v78_v31 = vmul.f32 %v71_v14, %v60_v27  ;;  %v79_v32 = vmul.f32 %v75_v15, %v61_v28 }
  0xa4   :  { %v114_v33 = vadd.f32 %v112_v29, %v78_v31  ;;  %v115_v34 = vadd.f32 %v113_v30, %v79_v32 }
  0xa6   :  { %v123_v35 = vadd.f32 %v115_v34, %v114_v33 }
  0xa8   :  { %124 = vadd.xlane.f32.xlu0 %v123_v35 }
 0x135   :  { %v125_v36 = vpop.xlane.xlu0 %124 }
 0x136   :  { %v126_v37 = vrot.slane %v125_v36, 4 }
 0x138   :  { %v127_v38 = vadd.f32 %v126_v37, %v125_v36 }
 0x13a   :  { %v128_v39 = vrot.slane %v127_v38, 2 }
 0x13c   :  { %v129_v40 = vadd.f32 %v128_v39, %v127_v38 }
 0x13e   :  { %v130_v41 = vrot.slane %v129_v40, 1 }
 0x140   :  { %v131_v42 = vadd.f32 %v130_v41, %v129_v40 }
 0x142   :  { %151 = vpush %v131_v42 }
 0x173   :  { %s152_s7 = spop %151 }
 0x174   :  { %v133_v43 = vstv %s152_s7 }
 0x175   :  { %134 = vst [vmem:[#allocation8] sm:$0xff] %v133_v43 }
 0x176   :  { %213 = shalt.err (!%p210_p6)
}
 0x177   :  { %s214_s11 = scalar_lea.hbm %s288_s2, 128 }
 0x178   :  { %p215_p7 = scmp.ne.s32.totalorder %s288_s2, %s214_s11  ;;  %p218_p8 = scmp.lt.u32.totalorder %s214_s11, %s288_s2 }
 0x17a   :  { %p220_p9 = pnand %p218_p8, %p215_p7 }
 0x17c   :  { %223 = shalt.err (!%p220_p9)
}
 0x17d   :  { %144 = dma.vmem_to_hbm [thread:$0]  %s142_s6, 128, %s288_s2, [#allocation5]  }
 0x17e   :  { %228 = dma.done.wait [#allocation5], 128  }
 0x17f   :  { %229 = vsyncadd [#allocation5], 4294967168 }
 0x180   :  { %148 = vsyncpa [#allocation4], 1 }
 0x181   :  { %149 = vsyncpa [#allocation7], 1 }
 0x182   :  { %150 = vsyncpa [#allocation5], 1 }

</bundles_post_ra>
